<compile_context>
chip_gen: v6e
topology: v6e:2x2x1
jax: 0.10.0
libtpu: 0.0.40
codegen_flags: <defaults>
</compile_context>

<pallas_src>
import functools

import jax
import jax.numpy as jnp
from jax.experimental import pallas as pl
from jax.experimental.pallas import tpu as pltpu


def _round_up(n, m):
    return (n + m - 1) // m * m


def _mlp_softmax_kernel(n_layers, x_ref, mask_ref, *refs):
    """refs = [w0, b0, w1, b1, ..., w_{n-1}, b_{n-1}, out]."""
    out_ref = refs[-1]
    params = refs[:-1]

    h = x_ref[...]                                   # f32 activations
    for i in range(n_layers):
        w = params[2 * i][...]
        b = params[2 * i + 1][...].astype(jnp.float32)
        # MXU matmul; f32 accumulation.  (Cast is a no-op when w is f32;
        # TODO(synk): on v6e/v7x pass param_dtype=jnp.bfloat16 for 2x MXU rate.)
        h = jnp.dot(h.astype(w.dtype), w, preferred_element_type=jnp.float32) + b
        if i < n_layers - 1:                         # ReLU after every Linear but last
            h = jnp.maximum(h, 0.0)

    # masked_fill(mask.bool(), -1e8) pre-folded into an additive bias:
    # real masked lanes and padded lanes carry -1e8, everything else 0.
    masked = h + mask_ref[...]

    # softmax over the feature axis (dim=1)
    m = jnp.max(masked, axis=1, keepdims=True)
    e = jnp.exp(masked - m)
    s = jnp.sum(e, axis=1, keepdims=True)

    # EUP approximate reciprocal + two Newton steps (full f32 precision, no divide)
    inv = pl.reciprocal(s, approx=True)
    inv = inv * (2.0 - s * inv)
    inv = inv * (2.0 - s * inv)

    out_ref[...] = (e * inv).astype(out_ref.dtype)


def policy_feedforward(x, mask, weights, biases, *, block_b=128,
                       param_dtype=jnp.float32):
    """x: (B, input_dim) f32, mask: (B, graph_size) f32 (nonzero => masked)."""
    B, in_dim = x.shape
    n_layers = len(weights)
    graph_size = weights[-1].shape[1]

    # ---- lane-dense output: pad final layer to a multiple of 128 lanes --------
    out_pad = _round_up(max(graph_size, 128), 128)
    w_last = jnp.zeros((weights[-1].shape[0], out_pad), weights[-1].dtype)
    w_last = w_last.at[:, :graph_size].set(weights[-1])
    b_last = jnp.zeros((1, out_pad), biases[-1].dtype)
    b_last = b_last.at[:, :graph_size].set(biases[-1])
    weights = list(weights[:-1]) + [w_last]
    biases = list(biases[:-1]) + [b_last]

    weights = [w.astype(param_dtype) for w in weights]
    biases = [b.astype(jnp.float32) for b in biases]

    # ---- batch tiling ----------------------------------------------------------
    tb = block_b if B >= block_b else _round_up(B, 8)
    b_pad = _round_up(B, tb)
    grid = (b_pad // tb,)

    x_pad = jnp.zeros((b_pad, in_dim), jnp.float32).at[:B, :].set(x)

    # mask folded into an additive bias; padded lanes/rows get -1e8 too.
    mask_add = jnp.full((b_pad, out_pad), -1e8, jnp.float32)
    mask_add = mask_add.at[:B, :graph_size].set(
        jnp.where(mask != 0, jnp.float32(-1e8), jnp.float32(0.0)))

    flat_params = [p for wb in zip(weights, biases) for p in wb]

    in_specs = [
        pl.BlockSpec((tb, in_dim), lambda i: (i, 0)),       # x tile, pipelined
        pl.BlockSpec((tb, out_pad), lambda i: (i, 0)),      # mask tile, pipelined
    ] + [
        pl.BlockSpec(p.shape, lambda i: (0, 0))             # weights/biases: resident
        for p in flat_params
    ]
    out_specs = pl.BlockSpec((tb, out_pad), lambda i: (i, 0))

    kernel = functools.partial(_mlp_softmax_kernel, n_layers)

    out = pl.pallas_call(
        kernel,
        out_shape=jax.ShapeDtypeStruct((b_pad, out_pad), jnp.float32),
        grid=grid,
        in_specs=in_specs,
        out_specs=out_specs,
        compiler_params=pltpu.CompilerParams(
            dimension_semantics=("parallel",)),
    )(x_pad, mask_add, *flat_params)

    return out[:B, :graph_size]


def _init_params(key, num_nodes, layer_size, layer_number):
    """Deterministic synthetic init matching PolicyFeedForward.__init__ shapes."""
    input_dim = num_nodes * num_nodes + num_nodes + 1
    dims = [input_dim] + [layer_size] * layer_number + [num_nodes]
    weights, biases = [], []
    for i in range(len(dims) - 1):
        key, kw, kb = jax.random.split(key, 3)
        fan_in = dims[i]
        scale = 1.0 / jnp.sqrt(jnp.float32(fan_in))
        weights.append(jax.random.uniform(kw, (dims[i], dims[i + 1]),
                                          jnp.float32, -scale, scale))
        biases.append(jax.random.uniform(kb, (1, dims[i + 1]),
                                         jnp.float32, -scale, scale))
    return weights, biases


def _reference(x, mask, weights, biases):
    h = x
    n = len(weights)
    for i, (w, b) in enumerate(zip(weights, biases)):
        h = h @ w + b
        if i < n - 1:
            h = jnp.maximum(h, 0.0)
    masked = jnp.where(mask != 0, -1e8, h)
    return jax.nn.softmax(masked, axis=1)


if __name__ == "__main__":
    # config: num_nodes=8, layer_size=32, layer_number=3
    num_nodes, layer_size, layer_number = 8, 32, 3
    input_dim = num_nodes * num_nodes + num_nodes + 1   # 73

    key = jax.random.PRNGKey(0)
    key, kx, km = jax.random.split(key, 3)

    # --- small shapes (matches the module spec) --------------------------------
    batch = 2
    x = jax.random.normal(kx, (batch, input_dim), jnp.float32)
    mask = (jax.random.uniform(km, (batch, num_nodes)) < 0.3).astype(jnp.float32)
    mask = mask.at[:, 0].set(0.0)   # keep at least one unmasked entry per row

    weights, biases = _init_params(key, num_nodes, layer_size, layer_number)

    probs = jax.block_until_ready(policy_feedforward(x, mask, weights, biases))
    ref = _reference(x, mask, weights, biases)
    assert probs.shape == (batch, num_nodes)
    assert jnp.allclose(probs, ref, atol=1e-5, rtol=1e-5), (probs, ref)
    assert jnp.allclose(jnp.sum(probs, axis=1), 1.0, atol=1e-5)

    # --- larger batch: exercises multi-step grid, pipelining and row padding ---
    batch2 = 300
    key, kx2, km2 = jax.random.split(key, 3)
    x2 = jax.random.normal(kx2, (batch2, input_dim), jnp.float32)
    mask2 = (jax.random.uniform(km2, (batch2, num_nodes)) < 0.3).astype(jnp.float32)
    mask2 = mask2.at[:, 0].set(0.0)

    probs2 = jax.block_until_ready(policy_feedforward(x2, mask2, weights, biases))
    ref2 = _reference(x2, mask2, weights, biases)
    assert probs2.shape == (batch2, num_nodes)
    assert jnp.allclose(probs2, ref2, atol=1e-5, rtol=1e-5)
    assert jnp.allclose(jnp.sum(probs2, axis=1), 1.0, atol=1e-5)

    print("KERNEL_OK")
</pallas_src>

<mosaic_0001>
module attributes {stable_mosaic.version = 11 : i64} {
  func.func @_mlp_softmax_kernel(%arg0: i32, %arg1: memref<8x73xf32, #tpu.memory_space<vmem>>, %arg2: memref<8x128xf32, #tpu.memory_space<vmem>>, %arg3: memref<73x32xf32, #tpu.memory_space<vmem>>, %arg4: memref<1x32xf32, #tpu.memory_space<vmem>>, %arg5: memref<32x32xf32, #tpu.memory_space<vmem>>, %arg6: memref<1x32xf32, #tpu.memory_space<vmem>>, %arg7: memref<32x32xf32, #tpu.memory_space<vmem>>, %arg8: memref<1x32xf32, #tpu.memory_space<vmem>>, %arg9: memref<32x128xf32, #tpu.memory_space<vmem>>, %arg10: memref<1x128xf32, #tpu.memory_space<vmem>>, %arg11: memref<8x128xf32, #tpu.memory_space<vmem>>) attributes {dimension_semantics = [#tpu.dimension_semantics<parallel>], iteration_bounds = array<i64: 1>, scalar_prefetch = 0 : i64, scratch_operands = 0 : i64, tpu.core_type = #tpu.core_type<tc>, window_params = [{transform_indices = @transform_0, window_bounds = array<i64: 8, 73>}, {transform_indices = @transform_1, window_bounds = array<i64: 8, 128>}, {pipeline_mode = #tpu.pipeline_mode<synchronous>, transform_indices = @transform_2, window_bounds = array<i64: 73, 32>}, {pipeline_mode = #tpu.pipeline_mode<synchronous>, transform_indices = @transform_3, window_bounds = array<i64: 1, 32>}, {pipeline_mode = #tpu.pipeline_mode<synchronous>, transform_indices = @transform_4, window_bounds = array<i64: 32, 32>}, {pipeline_mode = #tpu.pipeline_mode<synchronous>, transform_indices = @transform_5, window_bounds = array<i64: 1, 32>}, {pipeline_mode = #tpu.pipeline_mode<synchronous>, transform_indices = @transform_6, window_bounds = array<i64: 32, 32>}, {pipeline_mode = #tpu.pipeline_mode<synchronous>, transform_indices = @transform_7, window_bounds = array<i64: 1, 32>}, {pipeline_mode = #tpu.pipeline_mode<synchronous>, transform_indices = @transform_8, window_bounds = array<i64: 32, 128>}, {pipeline_mode = #tpu.pipeline_mode<synchronous>, transform_indices = @transform_9, window_bounds = array<i64: 1, 128>}, {transform_indices = @transform_10, window_bounds = array<i64: 8, 128>}]} {
    %c0 = arith.constant 0 : index
    %c0_0 = arith.constant 0 : index
    %0 = vector.load %arg1[%c0, %c0_0] : memref<8x73xf32, #tpu.memory_space<vmem>>, vector<8x73xf32>
    %c0_1 = arith.constant 0 : index
    %c0_2 = arith.constant 0 : index
    %1 = vector.load %arg3[%c0_1, %c0_2] : memref<73x32xf32, #tpu.memory_space<vmem>>, vector<73x32xf32>
    %c0_3 = arith.constant 0 : index
    %c0_4 = arith.constant 0 : index
    %2 = vector.load %arg4[%c0_3, %c0_4] : memref<1x32xf32, #tpu.memory_space<vmem>>, vector<1x32xf32>
    %cst = arith.constant dense<0.000000e+00> : vector<8x32xf32>
    %3 = tpu.matmul %0, %1, %cst {dimension_numbers = #tpu.dot_dimension_numbers<[1], [0], [0], [1], [0, 0, 1, 1], [], []>} : vector<8x73xf32>, vector<73x32xf32>, vector<8x32xf32> -> vector<8x32xf32>
    %4 = vector.broadcast %2 : vector<1x32xf32> to vector<8x32xf32>
    %5 = arith.addf %3, %4 : vector<8x32xf32>
    %cst_5 = arith.constant 0.000000e+00 : f32
    %6 = vector.broadcast %cst_5 : f32 to vector<8x32xf32>
    %7 = arith.maximumf %5, %6 : vector<8x32xf32>
    %c0_6 = arith.constant 0 : index
    %c0_7 = arith.constant 0 : index
    %8 = vector.load %arg5[%c0_6, %c0_7] : memref<32x32xf32, #tpu.memory_space<vmem>>, vector<32x32xf32>
    %c0_8 = arith.constant 0 : index
    %c0_9 = arith.constant 0 : index
    %9 = vector.load %arg6[%c0_8, %c0_9] : memref<1x32xf32, #tpu.memory_space<vmem>>, vector<1x32xf32>
    %cst_10 = arith.constant dense<0.000000e+00> : vector<8x32xf32>
    %10 = tpu.matmul %7, %8, %cst_10 {dimension_numbers = #tpu.dot_dimension_numbers<[1], [0], [0], [1], [0, 0, 1, 1], [], []>} : vector<8x32xf32>, vector<32x32xf32>, vector<8x32xf32> -> vector<8x32xf32>
    %11 = vector.broadcast %9 : vector<1x32xf32> to vector<8x32xf32>
    %12 = arith.addf %10, %11 : vector<8x32xf32>
    %cst_11 = arith.constant 0.000000e+00 : f32
    %13 = vector.broadcast %cst_11 : f32 to vector<8x32xf32>
    %14 = arith.maximumf %12, %13 : vector<8x32xf32>
    %c0_12 = arith.constant 0 : index
    %c0_13 = arith.constant 0 : index
    %15 = vector.load %arg7[%c0_12, %c0_13] : memref<32x32xf32, #tpu.memory_space<vmem>>, vector<32x32xf32>
    %c0_14 = arith.constant 0 : index
    %c0_15 = arith.constant 0 : index
    %16 = vector.load %arg8[%c0_14, %c0_15] : memref<1x32xf32, #tpu.memory_space<vmem>>, vector<1x32xf32>
    %cst_16 = arith.constant dense<0.000000e+00> : vector<8x32xf32>
    %17 = tpu.matmul %14, %15, %cst_16 {dimension_numbers = #tpu.dot_dimension_numbers<[1], [0], [0], [1], [0, 0, 1, 1], [], []>} : vector<8x32xf32>, vector<32x32xf32>, vector<8x32xf32> -> vector<8x32xf32>
    %18 = vector.broadcast %16 : vector<1x32xf32> to vector<8x32xf32>
    %19 = arith.addf %17, %18 : vector<8x32xf32>
    %cst_17 = arith.constant 0.000000e+00 : f32
    %20 = vector.broadcast %cst_17 : f32 to vector<8x32xf32>
    %21 = arith.maximumf %19, %20 : vector<8x32xf32>
    %c0_18 = arith.constant 0 : index
    %c0_19 = arith.constant 0 : index
    %22 = vector.load %arg9[%c0_18, %c0_19] : memref<32x128xf32, #tpu.memory_space<vmem>>, vector<32x128xf32>
    %c0_20 = arith.constant 0 : index
    %c0_21 = arith.constant 0 : index
    %23 = vector.load %arg10[%c0_20, %c0_21] : memref<1x128xf32, #tpu.memory_space<vmem>>, vector<1x128xf32>
    %cst_22 = arith.constant dense<0.000000e+00> : vector<8x128xf32>
    %24 = tpu.matmul %21, %22, %cst_22 {dimension_numbers = #tpu.dot_dimension_numbers<[1], [0], [0], [1], [0, 0, 1, 1], [], []>} : vector<8x32xf32>, vector<32x128xf32>, vector<8x128xf32> -> vector<8x128xf32>
    %25 = vector.broadcast %23 : vector<1x128xf32> to vector<8x128xf32>
    %26 = arith.addf %24, %25 : vector<8x128xf32>
    %c0_23 = arith.constant 0 : index
    %c0_24 = arith.constant 0 : index
    %27 = vector.load %arg2[%c0_23, %c0_24] : memref<8x128xf32, #tpu.memory_space<vmem>>, vector<8x128xf32>
    %28 = arith.addf %26, %27 : vector<8x128xf32>
    %cst_25 = arith.constant dense<0xFF800000> : vector<8xf32>
    %29 = vector.multi_reduction <maximumf>, %28, %cst_25 [1] : vector<8x128xf32> to vector<8xf32>
    %30 = vector.shape_cast %29 : vector<8xf32> to vector<8x1xf32>
    %31 = vector.broadcast %30 : vector<8x1xf32> to vector<8x128xf32>
    %32 = arith.subf %28, %31 : vector<8x128xf32>
    %33 = math.exp %32 : vector<8x128xf32>
    %cst_26 = arith.constant dense<0.000000e+00> : vector<8xf32>
    %34 = vector.multi_reduction <add>, %33, %cst_26 [1] : vector<8x128xf32> to vector<8xf32>
    %35 = vector.shape_cast %34 : vector<8xf32> to vector<8x1xf32>
    %36 = tpu.reciprocal %35 {approx = true} : vector<8x1xf32> -> vector<8x1xf32>
    %37 = arith.mulf %35, %36 : vector<8x1xf32>
    %cst_27 = arith.constant 2.000000e+00 : f32
    %38 = vector.broadcast %cst_27 : f32 to vector<8x1xf32>
    %39 = arith.subf %38, %37 : vector<8x1xf32>
    %40 = arith.mulf %36, %39 : vector<8x1xf32>
    %41 = arith.mulf %35, %40 : vector<8x1xf32>
    %cst_28 = arith.constant 2.000000e+00 : f32
    %42 = vector.broadcast %cst_28 : f32 to vector<8x1xf32>
    %43 = arith.subf %42, %41 : vector<8x1xf32>
    %44 = arith.mulf %40, %43 : vector<8x1xf32>
    %45 = vector.broadcast %44 : vector<8x1xf32> to vector<8x128xf32>
    %46 = arith.mulf %33, %45 : vector<8x128xf32>
    %c0_29 = arith.constant 0 : index
    %c0_30 = arith.constant 0 : index
    %47 = vector.load %arg11[%c0_29, %c0_30] : memref<8x128xf32, #tpu.memory_space<vmem>>, vector<8x128xf32>
    tpu.vector_store %arg11[%c0_29, %c0_30], %46 {strides = array<i32>} : memref<8x128xf32, #tpu.memory_space<vmem>>, vector<8x128xf32>,
    return
  }
  func.func @transform_0(%arg0: i32) -> (i32, i32) {
    %c0_i32 = arith.constant 0 : i32
    %c0_i32_0 = arith.constant 0 : i32
    return %arg0, %c0_i32 : i32, i32
  }
  func.func @transform_1(%arg0: i32) -> (i32, i32) {
    %c0_i32 = arith.constant 0 : i32
    %c0_i32_0 = arith.constant 0 : i32
    return %arg0, %c0_i32 : i32, i32
  }
  func.func @transform_2(%arg0: i32) -> (i32, i32) {
    %c0_i32 = arith.constant 0 : i32
    %c0_i32_0 = arith.constant 0 : i32
    %c0_i32_1 = arith.constant 0 : i32
    return %c0_i32, %c0_i32_0 : i32, i32
  }
  func.func @transform_3(%arg0: i32) -> (i32, i32) {
    %c0_i32 = arith.constant 0 : i32
    %c0_i32_0 = arith.constant 0 : i32
    %c0_i32_1 = arith.constant 0 : i32
    return %c0_i32, %c0_i32_0 : i32, i32
  }
  func.func @transform_4(%arg0: i32) -> (i32, i32) {
    %c0_i32 = arith.constant 0 : i32
    %c0_i32_0 = arith.constant 0 : i32
    %c0_i32_1 = arith.constant 0 : i32
    return %c0_i32, %c0_i32_0 : i32, i32
  }
  func.func @transform_5(%arg0: i32) -> (i32, i32) {
    %c0_i32 = arith.constant 0 : i32
    %c0_i32_0 = arith.constant 0 : i32
    %c0_i32_1 = arith.constant 0 : i32
    return %c0_i32, %c0_i32_0 : i32, i32
  }
  func.func @transform_6(%arg0: i32) -> (i32, i32) {
    %c0_i32 = arith.constant 0 : i32
    %c0_i32_0 = arith.constant 0 : i32
    %c0_i32_1 = arith.constant 0 : i32
    return %c0_i32, %c0_i32_0 : i32, i32
  }
  func.func @transform_7(%arg0: i32) -> (i32, i32) {
    %c0_i32 = arith.constant 0 : i32
    %c0_i32_0 = arith.constant 0 : i32
    %c0_i32_1 = arith.constant 0 : i32
    return %c0_i32, %c0_i32_0 : i32, i32
  }
  func.func @transform_8(%arg0: i32) -> (i32, i32) {
    %c0_i32 = arith.constant 0 : i32
    %c0_i32_0 = arith.constant 0 : i32
    %c0_i32_1 = arith.constant 0 : i32
    return %c0_i32, %c0_i32_0 : i32, i32
  }
  func.func @transform_9(%arg0: i32) -> (i32, i32) {
    %c0_i32 = arith.constant 0 : i32
    %c0_i32_0 = arith.constant 0 : i32
    %c0_i32_1 = arith.constant 0 : i32
    return %c0_i32, %c0_i32_0 : i32, i32
  }
  func.func @transform_10(%arg0: i32) -> (i32, i32) {
    %c0_i32 = arith.constant 0 : i32
    %c0_i32_0 = arith.constant 0 : i32
    return %arg0, %c0_i32 : i32, i32
  }
}

</mosaic_0001>

<bundles_post_ra>
// kernel: tpu_custom_call.1
= control target key start
LH: loop header
LB: loop body
LE: loop exit
PB: predicated region body
PF: predicated region fallthrough
CT: control target
= control target key end

     0   :  { %vm58_vm0 = vcmask 1040384   ;;  %v540_v1 = vmov 0.0   ;;  %vm541_vm1 = vmmov 0   ;;  %s718_s0 = inlined_call_operand.vmem [shape: f32[8,73], index: 0, kind: input, shape index: {}]   ;;  %s719_s1 = inlined_call_operand.vmem [shape: f32[8,128], index: 1, kind: input, shape index: {}]   ;;  %s720_s2 = inlined_call_operand.vmem [shape: f32[73,32], index: 2, kind: input, shape index: {}]   ;;  %s721_s3 = inlined_call_operand.vmem [shape: f32[1,32], index: 3, kind: input, shape index: {}]   ;;  %s722_s4 = inlined_call_operand.vmem [shape: f32[32,32], index: 4, kind: input, shape index: {}]   ;;  %s723_s5 = inlined_call_operand.vmem [shape: f32[1,32], index: 5, kind: input, shape index: {}]   ;;  %s724_s6 = inlined_call_operand.vmem [shape: f32[32,32], index: 6, kind: input, shape index: {}]   ;;  %s725_s7 = inlined_call_operand.vmem [shape: f32[1,32], index: 7, kind: input, shape index: {}]   ;;  %s726_s8 = inlined_call_operand.vmem [shape: f32[32,128], index: 8, kind: input, shape index: {}]   ;;  %s727_s9 = inlined_call_operand.vmem [shape: f32[1,128], index: 9, kind: input, shape index: {}]   ;;  %s728_s10 = inlined_call_operand.hbm [shape: f32[8,128], index: 10, kind: output, shape index: {}]  }
   0x1   :  { %v46_v0 = vld [vmem:[%s720_s2 + $0x48] sm:$0x1]  ;;  %455 = vmatprep.subr.mxu0 %v540_v1  ;;  %v45_v2 = vld [vmem:[%s720_s2 + $0x40] sm:$0xff]  ;;  %478 = vmatprep.subr.mxu1 %v540_v1  ;;  %v44_v3 = vld [vmem:[%s720_s2 + $0x38] sm:$0xff] }
   0x2   :  { %456 = vmatpush3.msk.msra.mxu0 %vm58_vm0, %v46_v0  ;;  %475 = vmatprep.mubr.msk.f32.mxu0 %vm541_vm1, %v540_v1  ;;  %v136_v4 = vld [vmem:[%s722_s4 + $0x18] sm:$0xff] }
   0x3   :  { %457 = vmatprep.subr.mxu0 %v540_v1  ;;  %486 = vmatprep.mubr.msk.f32.mxu1 %vm541_vm1, %v540_v1 }
   0x4   :  { %458 = vmatpush3.msra.mxu0 %v45_v2  ;;  %479 = vmatpush3.msra.mxu1 %v136_v4 }
   0x5   :  { %15 = vsyncpa [#allocation3], 0  ;;  %459 = vmatprep.subr.mxu0 %v540_v1  ;;  %v43_v5 = vld [vmem:[%s720_s2 + $0x30] sm:$0xff]  ;;  %480 = vmatprep.subr.mxu1 %v540_v1  ;;  %v42_v6 = vld [vmem:[%s720_s2 + $0x28] sm:$0xff]  ;;  %vm54_vm2 = vcmask 596992   ;;  %vm144_vm3 = vcmask 261120  }
   0x6   :  { %460 = vmatpush3.msra.mxu0 %v44_v3  ;;  %v41_v7 = vld [vmem:[%s720_s2 + $0x20] sm:$0xff]  ;;  %v40_v8 = vld [vmem:[%s720_s2 + $0x18] sm:$0xff]  ;;  %v39_v9 = vld [vmem:[%s720_s2 + $0x10] sm:$0xff] }
   0x7   :  { %461 = vmatprep.subr.mxu0 %v540_v1  ;;  %v38_v10 = vld [vmem:[%s720_s2 + $0x8] sm:$0xff]  ;;  %v37_v11 = vld [vmem:[%s720_s2] sm:$0xff]  ;;  %v135_v13 = vld [vmem:[%s722_s4 + $0x10] sm:$0xff] }
   0x8   :  { %462 = vmatpush3.msra.mxu0 %v43_v5  ;;  %v36_v12 = vld [vmem:[%s718_s0] sm:$0xff]  ;;  %481 = vmatpush3.msra.mxu1 %v135_v13  ;;  %v134_v14 = vld [vmem:[%s722_s4 + $0x8] sm:$0xff]  ;;  %v222_v21 = vld [vmem:[%s724_s6 + $0x18] sm:$0xff] }
   0x9   :  { %463 = vmatprep.subr.mxu0 %v540_v1  ;;  %482 = vmatprep.subr.mxu1 %v540_v1  ;;  %v133_v15 = vld [vmem:[%s722_s4] sm:$0xff]  ;;  %v221_v22 = vld [vmem:[%s724_s6 + $0x10] sm:$0xff]  ;;  %v220_v23 = vld [vmem:[%s724_s6 + $0x8] sm:$0xff] }
   0xa   :  { %464 = vmatpush3.msra.mxu0 %v42_v6  ;;  %483 = vmatpush3.msra.mxu1 %v134_v14  ;;  %v420_v16 = vld [vmem:[%s721_s3] ss:$0 sm:$0xff]  ;;  %v307_v30 = vld [vmem:[%s726_s8 + $0x18] sm:$0xff]  ;;  %v306_v31 = vld [vmem:[%s726_s8 + $0x10] sm:$0xff] }
   0xb   :  { %465 = vmatprep.subr.mxu0 %v540_v1  ;;  %484 = vmatprep.subr.mxu1 %v540_v1  ;;  %v219_v24 = vld [vmem:[%s724_s6] sm:$0xff]  ;;  %v305_v32 = vld [vmem:[%s726_s8 + $0x8] sm:$0xff] }
   0xc   :  { %466 = vmatpush3.msra.mxu0 %v41_v7  ;;  %485 = vmatpush3.msra.mxu1 %v133_v15  ;;  %v423_v25 = vld [vmem:[%s723_s5] ss:$0 sm:$0xff] }
   0xd   :  { %467 = vmatprep.subr.mxu0 %v540_v1  ;;  %489 = vmatprep.subr.mxu1 %v540_v1  ;;  %v304_v33 = vld [vmem:[%s726_s8] sm:$0xff] }
   0xe   :  { %468 = vmatpush3.msra.mxu0 %v40_v8  ;;  %v425_v34 = vld [vmem:[%s725_s7] ss:$0 sm:$0xff]  ;;  %s542_s7 = smov [#allocation2]  }
   0xf   :  { %469 = vmatprep.subr.mxu0 %v540_v1  ;;  %v427_v39 = vld [vmem:[%s727_s9] ss:$0 sm:$0xff] }
  0x10   :  { %470 = vmatpush3.msra.mxu0 %v39_v9  ;;  %v388_v41 = vld [vmem:[%s719_s1] sm:$0xff]  ;;  %s412_s1 = sshll.u32 %s542_s7, 4  ;;  %s413_s1 = int_to_ptr.vmem [resolvable:$true] %s412_s1 }
  0x11   :  { %471 = vmatprep.subr.mxu0 %v540_v1  ;;  %s518_s8 = scalar_lea.vmem %s413_s1, 128  ;;  %p523_p1 = scmp.lt.s32.totalorder %s413_s1, %s413_s1 }
  0x12   :  { %472 = vmatpush3.msra.mxu0 %v38_v10  ;;  %p519_p0 = scmp.ne.s32.totalorder %s413_s1, %s518_s8  ;;  %p524_p2 = scmp.lt.s32.totalorder %s518_s8, %s518_s8 }
  0x13   :  { %473 = vmatprep.subr.mxu0 %v540_v1 }
  0x14   :  { %474 = vmatpush3.msra.mxu0 %v37_v11  ;;  %p525_p3 = por %p524_p2, %p523_p1 }
  0x15   :  { %476 = vmatmul.mubr.msk.f32.vlgmr.msra.gmra.mxu0 %vm54_vm2, %v36_v12 }
  0x16   :  { %p526_p4 = pnand %p525_p3, %p519_p0 }
  0xd5   :  { %v128_v17 = vpop.f32.mrf.mxu0 }
  0xd6   :  { %v129_v18 = vadd.f32 %v420_v16, %v128_v17 }
  0xd7   :  { %v477_v19 = vpop.f32.mrf.mxu0 }
  0xd8   :  { %v132_v20 = vmax.f32 %v129_v18, 0.0 }
  0xda   :  { %487 = vmatmul.mubr.msk.f32.vlgmr.msra.gmra.mxu1 %vm144_vm3, %v132_v20 }
  0xdb   :  { %490 = vmatpush3.msra.mxu1 %v222_v21  ;;  %497 = vmatprep.mubr.msk.f32.mxu1 %vm541_vm1, %v540_v1 }
  0xdc   :  { %491 = vmatprep.subr.mxu1 %v540_v1 }
  0xdd   :  { %492 = vmatpush3.msra.mxu1 %v221_v22 }
  0xde   :  { %493 = vmatprep.subr.mxu1 %v540_v1 }
  0xdf   :  { %494 = vmatpush3.msra.mxu1 %v220_v23 }
  0xe0   :  { %495 = vmatprep.subr.mxu1 %v540_v1 }
  0xe1   :  { %496 = vmatpush3.msra.mxu1 %v219_v24 }
  0xe2   :  { %500 = vmatprep.subr.mxu1 %v540_v1 }
 0x19a   :  { %v214_v26 = vpop.f32.mrf.mxu1 }
 0x19b   :  { %v215_v27 = vadd.f32 %v423_v25, %v214_v26 }
 0x19c   :  { %v488_v28 = vpop.f32.mrf.mxu1 }
 0x19d   :  { %v218_v29 = vmax.f32 %v215_v27, 0.0 }
 0x19f   :  { %498 = vmatmul.mubr.msk.f32.vlgmr.msra.gmra.mxu1 %vm144_vm3, %v218_v29 }
 0x1a0   :  { %501 = vmatpush3.msra.mxu1 %v307_v30  ;;  %508 = vmatprep.mubr.msk.f32.mxu1 %vm541_vm1, %v540_v1 }
 0x1a1   :  { %502 = vmatprep.subr.mxu1 %v540_v1 }
 0x1a2   :  { %503 = vmatpush3.msra.mxu1 %v306_v31 }
 0x1a3   :  { %504 = vmatprep.subr.mxu1 %v540_v1 }
 0x1a4   :  { %505 = vmatpush3.msra.mxu1 %v305_v32 }
 0x1a5   :  { %506 = vmatprep.subr.mxu1 %v540_v1 }
 0x1a6   :  { %507 = vmatpush3.msra.mxu1 %v304_v33 }
 0x25f   :  { %v299_v35 = vpop.f32.mrf.mxu1 }
 0x260   :  { %v300_v36 = vadd.f32 %v425_v34, %v299_v35 }
 0x261   :  { %v499_v37 = vpop.f32.mrf.mxu1 }
 0x262   :  { %v303_v38 = vmax.f32 %v300_v36, 0.0 }
 0x264   :  { %509 = vmatmul.mubr.msk.f32.vlgmr.msra.gmra.mxu1 %vm144_vm3, %v303_v38 }
 0x324   :  { %v384_v40 = vpop.f32.mrf.mxu1 }
 0x325   :  { %v385_v42 = vadd.f32 %v427_v39, %v384_v40 }
 0x326   :  { %v510_v43 = vpop.f32.mrf.mxu1 }
 0x327   :  { %v389_v44 = vadd.f32 %v388_v41, %v385_v42 }
 0x329   :  { %390 = vmax.xlane.f32.xlu0 %v389_v44 }
 0x3b2   :  { %v391_v45 = vpop.xlane.xlu0 %390 }
 0x3b3   :  { %v392_v46 = vsub.f32 %v389_v44, %v391_v45 }
 0x3b5   :  { %v393_v47 = vmul.f32 1.442695, %v392_v46 }
 0x3b7   :  { %514 = vpow2.f32 %v393_v47 }
 0x3c4   :  { %v515_v48 = vpop.eup %514 }
 0x3c5   :  { %395 = vadd.xlane.f32.xlu0 %v515_v48 }
 0x44e   :  { %v396_v49 = vpop.xlane.xlu0 %395 }
 0x44f   :  { %516 = vrcp.f32 %v396_v49 }
 0x45c   :  { %v517_v50 = vpop.eup %516 }
 0x45d   :  { %v398_v51 = vmul.f32 %v517_v50, %v396_v49 }
 0x45f   :  { %v399_v52 = vsub.f32 2.0, %v398_v51 }
 0x461   :  { %v400_v53 = vmul.f32 %v517_v50, %v399_v52 }
 0x463   :  { %v401_v54 = vmul.f32 %v400_v53, %v396_v49 }
 0x465   :  { %v402_v55 = vsub.f32 2.0, %v401_v54 }
 0x467   :  { %v403_v56 = vmul.f32 %v402_v55, %v400_v53 }
 0x469   :  { %v404_v57 = vmul.f32 %v515_v48, %v403_v56 }
 0x46b   :  { %405 = vst [vmem:[#allocation2] sm:$0xff] %v404_v57 }
 0x46c   :  { %529 = shalt.err (!%p526_p4)
}
 0x46d   :  { %415 = dma.vmem_to_hbm [thread:$0]  %s413_s1, 128, %s728_s10, [#allocation3]  }
 0x46e   :  { %538 = dma.done.wait [#allocation3], 128  }
 0x46f   :  { %539 = vsyncadd [#allocation3], 4294967168 }
 0x470   :  { %419 = vsyncpa [#allocation3], 1 }

</bundles_post_ra>
